<compile_context>
chip_gen: v6e
topology: v6e:2x2x1
jax: 0.10.0
libtpu: 0.0.40
codegen_flags: <defaults>
</compile_context>

<pallas_src>
import jax
import jax.numpy as jnp
from jax.experimental import pallas as pl
from jax.experimental.pallas import tpu as pltpu


def affine_kernel(x_ref, w_ref, b_ref, o_ref):
    """y = x @ W + b with tiny K, computed as K broadcast-FMA terms on the VPU."""
    B = x_ref.shape[0]
    K = x_ref.shape[1]          # tiny (3): keep it off the MXU
    N = w_ref.shape[1]

    x = x_ref[...]
    acc = jnp.broadcast_to(b_ref[...], (B, N))
    for k in range(K):          # static unroll, stays on the VPU
        acc = acc + x[:, k:k + 1] * w_ref[k:k + 1, :]
    o_ref[...] = acc.astype(o_ref.dtype)


def _affine_pallas(x, w, b, *, batch_tile=512):
    B, K = x.shape
    N = w.shape[1]
    out_shape = jax.ShapeDtypeStruct((B, N), x.dtype)

    if B <= batch_tile:
        # Single-shot: whole (tiny) arrays live in VMEM.  No grid / pipeline
        # bookkeeping, no padding, no output slice.  (At this output width the
        # store is masked; padding it to 128 lanes would cost a wrapper slice,
        # which the review ranked as the bigger overhead at these sizes.)
        return pl.pallas_call(
            affine_kernel,
            out_shape=out_shape,
            in_specs=[pl.BlockSpec(memory_space=pltpu.MemorySpace.VMEM)] * 3,
            out_specs=pl.BlockSpec(memory_space=pltpu.MemorySpace.VMEM),
        )(x, w, b)

    # Batch-tiled path for realistic batch sizes: double-buffered HBM<->VMEM
    # pipelining over the batch axis, weights/bias grid-invariant, batch axis
    # marked 'parallel' so v7x's two TensorCores split the grid.
    TB = batch_tile
    return pl.pallas_call(
        affine_kernel,
        out_shape=out_shape,
        grid=(pl.cdiv(B, TB),),
        in_specs=[
            pl.BlockSpec((TB, K), lambda i: (i, 0)),
            pl.BlockSpec((K, N), lambda i: (0, 0)),
            pl.BlockSpec((1, N), lambda i: (0, 0)),
        ],
        out_specs=pl.BlockSpec((TB, N), lambda i: (i, 0)),
        compiler_params=pltpu.CompilerParams(
            dimension_semantics=("parallel",)),
    )(x, w, b)


@jax.jit
def torch_model_forward(x, w1, b1, w2, b2):
    # Exact fold of layer2(layer1(x)): no nonlinearity between the layers, so
    #   (x @ W1 + b1) @ W2 + b2 == x @ (W1 @ W2) + (b1 @ W2 + b2).
    # Weights are batch-independent, so this is two tiny HLOs (constant-folded
    # when weights are literals) and removes ~99% of the kernel work.
    hi = jax.lax.Precision.HIGHEST
    wf = jnp.dot(w1, w2, precision=hi)          # (in, out2)  == (3, 8)
    bf = jnp.dot(b1, w2, precision=hi) + b2     # (1, out2)   == (1, 8)
    return _affine_pallas(x, wf, bf)


def init_linear_params(key, in_features, out_features):
    # Deterministic init mimicking nn.Linear: U(-1/sqrt(fan_in), 1/sqrt(fan_in)).
    kw, kb = jax.random.split(key)
    bound = 1.0 / jnp.sqrt(jnp.float32(in_features))
    # Stored as (in_features, out_features) == PyTorch weight transposed.
    w = jax.random.uniform(kw, (in_features, out_features), jnp.float32, -bound, bound)
    b = jax.random.uniform(kb, (1, out_features), jnp.float32, -bound, bound)
    return w, b


if __name__ == "__main__":
    # Module: Linear(input_size, hidden_size) -> Linear(hidden_size, hidden_size2)
    input_size, hidden_size, hidden_size2 = 3, 32, 8

    key = jax.random.PRNGKey(0)
    _, k_l1, k_l2 = jax.random.split(key, 3)

    # Example input matching the script's 2x3 numpy array.
    x = jnp.array([[3.1, 1.3, 1.2], [2.1, 1.3, 13.0]], dtype=jnp.float32)

    w1, b1 = init_linear_params(k_l1, input_size, hidden_size)
    w2, b2 = init_linear_params(k_l2, hidden_size, hidden_size2)

    out = torch_model_forward(x, w1, b1, w2, b2)
    jax.block_until_ready(out)

    # Plain-JAX reference of the un-folded module forward (true f32 matmuls so
    # the comparison is not polluted by default bf16 dot decomposition).
    hi = jax.lax.Precision.HIGHEST
    ref = jnp.dot(jnp.dot(x, w1, precision=hi) + b1, w2, precision=hi) + b2
    assert out.shape == ref.shape
    assert jnp.allclose(out, ref, atol=1e-4, rtol=1e-4), float(jnp.max(jnp.abs(out - ref)))

    # TODO(synk): at ~50 real FLOPs a standalone pallas_call is pure launch
    # overhead; in production fuse this affine into the surrounding kernel and
    # rely on the batch-tiled path only for large batches.
    print("KERNEL_OK")
</pallas_src>

<mosaic_0001>
module attributes {stable_mosaic.version = 11 : i64} {
  func.func @affine_kernel(%arg0: memref<2x3xf32, #tpu.memory_space<vmem>>, %arg1: memref<3x8xf32, #tpu.memory_space<vmem>>, %arg2: memref<1x8xf32, #tpu.memory_space<vmem>>, %arg3: memref<2x8xf32, #tpu.memory_space<vmem>>) attributes {dimension_semantics = [], scalar_prefetch = 0 : i64, scratch_operands = 0 : i64, tpu.core_type = #tpu.core_type<tc>} {
    %c0 = arith.constant 0 : index
    %c0_0 = arith.constant 0 : index
    %0 = vector.load %arg0[%c0, %c0_0] : memref<2x3xf32, #tpu.memory_space<vmem>>, vector<2x3xf32>
    %c0_1 = arith.constant 0 : index
    %c0_2 = arith.constant 0 : index
    %1 = vector.load %arg2[%c0_1, %c0_2] : memref<1x8xf32, #tpu.memory_space<vmem>>, vector<1x8xf32>
    %2 = vector.shape_cast %1 : vector<1x8xf32> to vector<1x8xf32>
    %3 = vector.broadcast %2 : vector<1x8xf32> to vector<2x8xf32>
    %4 = vector.extract_strided_slice %0 {offsets = [0, 0], sizes = [2, 1], strides = [1, 1]} : vector<2x3xf32> to vector<2x1xf32>
    %c0_3 = arith.constant 0 : index
    %c0_4 = arith.constant 0 : index
    %5 = vector.load %arg1[%c0_3, %c0_4] : memref<3x8xf32, #tpu.memory_space<vmem>>, vector<1x8xf32>
    %6 = vector.broadcast %4 : vector<2x1xf32> to vector<2x8xf32>
    %7 = vector.broadcast %5 : vector<1x8xf32> to vector<2x8xf32>
    %8 = arith.mulf %6, %7 : vector<2x8xf32>
    %9 = arith.addf %3, %8 : vector<2x8xf32>
    %10 = vector.extract_strided_slice %0 {offsets = [0, 1], sizes = [2, 1], strides = [1, 1]} : vector<2x3xf32> to vector<2x1xf32>
    %c1 = arith.constant 1 : index
    %c0_5 = arith.constant 0 : index
    %11 = vector.load %arg1[%c1, %c0_5] : memref<3x8xf32, #tpu.memory_space<vmem>>, vector<1x8xf32>
    %12 = vector.broadcast %10 : vector<2x1xf32> to vector<2x8xf32>
    %13 = vector.broadcast %11 : vector<1x8xf32> to vector<2x8xf32>
    %14 = arith.mulf %12, %13 : vector<2x8xf32>
    %15 = arith.addf %9, %14 : vector<2x8xf32>
    %16 = vector.extract_strided_slice %0 {offsets = [0, 2], sizes = [2, 1], strides = [1, 1]} : vector<2x3xf32> to vector<2x1xf32>
    %c2 = arith.constant 2 : index
    %c0_6 = arith.constant 0 : index
    %17 = vector.load %arg1[%c2, %c0_6] : memref<3x8xf32, #tpu.memory_space<vmem>>, vector<1x8xf32>
    %18 = vector.broadcast %16 : vector<2x1xf32> to vector<2x8xf32>
    %19 = vector.broadcast %17 : vector<1x8xf32> to vector<2x8xf32>
    %20 = arith.mulf %18, %19 : vector<2x8xf32>
    %21 = arith.addf %15, %20 : vector<2x8xf32>
    %c0_7 = arith.constant 0 : index
    %c0_8 = arith.constant 0 : index
    %22 = vector.load %arg3[%c0_7, %c0_8] : memref<2x8xf32, #tpu.memory_space<vmem>>, vector<2x8xf32>
    tpu.vector_store %arg3[%c0_7, %c0_8], %21 {strides = array<i32>} : memref<2x8xf32, #tpu.memory_space<vmem>>, vector<2x8xf32>,
    return
  }
}

</mosaic_0001>

<bundles_post_ra>
// kernel: torch_model_forward.1
= control target key start
LH: loop header
LB: loop body
LE: loop exit
PB: predicated region body
PF: predicated region fallthrough
CT: control target
= control target key end

     0   :  { %v107_v1 = vmov 0   ;;  %v108_v2 = vmov 2   ;;  %s149_s0 = inlined_call_operand.vmem [shape: f32[2,3], index: 0, kind: input, shape index: {}]   ;;  %s150_s1 = inlined_call_operand.vmem [shape: f32[3,8], index: 1, kind: input, shape index: {}]   ;;  %s151_s2 = inlined_call_operand.vmem [shape: f32[1,8], index: 2, kind: input, shape index: {}]   ;;  %s152_s3 = inlined_call_operand.hbm [shape: f32[2,8], index: 3, kind: output, shape index: {}]  }
   0x1   :  { %v15_v0 = vld [vmem:[%s149_s0] sm:$0x3]  ;;  %81 = vset.pattern.permute.xlu0 %v107_v1  ;;  %83 = vset.pattern.permute.xlu1 %v108_v2 }
   0x2   :  { %26 = vperm.xlu0 %81, %v15_v0   ;;  %48 = vperm.xlu1 %83, %v15_v0  }
   0x3   :  { %8 = vsyncpa [#allocation3], 0  ;;  %v109_v3 = vmov 1   ;;  %v74_v4 = vld [vmem:[%s150_s1] ss:$0 sm:$0xff]  ;;  %s110_s21 = smov [#allocation2]  }
   0x4   :  { %v73_v7 = vld [vmem:[%s151_s2] ss:$0 sm:$0xff]  ;;  %v75_v8 = vld [vmem:[%s150_s1 + $0x1] ss:$0 sm:$0xff]  ;;  %v76_v9 = vld [vmem:[%s150_s1 + $0x2] ss:$0 sm:$0xff] }
   0x5   :  { %s65_s22 = sshll.u32 %s110_s21, 4  ;;  %vm57_vm0 = vcmask 58368   ;;  %s66_s22 = int_to_ptr.vmem [resolvable:$true] %s65_s22 }
   0x6   :  { %82 = vset.pattern.permute.xlu0 %v109_v3  ;;  %s85_s2 = scalar_lea.vmem %s66_s22, 32  ;;  %p90_p1 = scmp.lt.s32.totalorder %s66_s22, %s66_s22 }
   0x7   :  { %37 = vperm.xlu0 %82, %v15_v0   ;;  %p86_p0 = scmp.ne.s32.totalorder %s66_s22, %s85_s2  ;;  %p91_p2 = scmp.lt.s32.totalorder %s85_s2, %s85_s2 }
   0x9   :  { %p92_p3 = por %p91_p2, %p90_p1 }
   0xb   :  { %84 = vset.pattern.permute.xlu0 %v108_v2  ;;  %p93_p4 = pnand %p92_p3, %p86_p0 }
  0x7d   :  { %v27_v5 = vpop.permute.xlu0 %26  ;;  %v49_v10 = vpop.permute.xlu1 %48 }
  0x7e   :  { %v33_v6 = vmul.f32 %v74_v4, %v27_v5  ;;  %v55_v14 = vmul.f32 %v76_v9, %v49_v10 }
  0x80   :  { %v34_v12 = vadd.f32 %v73_v7, %v33_v6 }
  0x82   :  { %v38_v11 = vpop.permute.xlu0 %37 }
  0x83   :  { %v44_v13 = vmul.f32 %v75_v8, %v38_v11 }
  0x85   :  { %v45_v15 = vadd.f32 %v44_v13, %v34_v12 }
  0x87   :  { %v56_v16 = vadd.f32 %v55_v14, %v45_v15 }
  0x89   :  { %58 = vst.msk [vmem:[#allocation2] sm:$0x3] %vm57_vm0, %v56_v16 }
  0x8a   :  { %96 = shalt.err (!%p93_p4)
}
  0x8b   :  { %68 = dma.vmem_to_hbm [thread:$0]  %s66_s22, 32, %s152_s3, [#allocation3]  }
  0x8c   :  { %105 = dma.done.wait [#allocation3], 32  }
  0x8d   :  { %106 = vsyncadd [#allocation3], 4294967264 }
  0x8e   :  { %72 = vsyncpa [#allocation3], 1 }

</bundles_post_ra>
